<compile_context>
chip_gen: v7x
topology: tpu7x:2x2x1
jax: 0.10.0
libtpu: 0.0.40
codegen_flags: <defaults>
</compile_context>

<pallas_src>
import functools

import jax
import jax.numpy as jnp
import numpy as np
from jax import lax
from jax.experimental import pallas as pl
from jax.experimental.pallas import tpu as pltpu

_LANES = 512            # lane-dense last dim (multiple of 128)
_MAX_BLOCK_ROWS = 1024  # 1024 x 512 f32 tile = 2 MiB per input buffer


def _focal_kernel(x_ref, y_ref, out_ref, acc_ref, *,
                  alpha, gamma, total, block_rows, scale, needs_mask):
    step = pl.program_id(0)

    @pl.when(step == 0)
    def _init():
        acc_ref[...] = jnp.zeros_like(acc_ref)

    x = x_ref[...].astype(jnp.float32)   # logits
    y = y_ref[...].astype(jnp.float32)   # labels

    # Numerically stable shared pieces (one exp + one log + one div, all EUP):
    e = jnp.exp(-jnp.abs(x))                     # exp(-|x|) in (0, 1]
    sp = jnp.log(1.0 + e)                        # softplus(-|x|)
    pos = x >= 0.0
    log_probs = jnp.where(pos, -sp, x - sp)      # log(sigmoid(x))
    log_1_probs = jnp.where(pos, -x - sp, -sp)   # log(1 - sigmoid(x))
    probs = jnp.where(pos, 1.0, e) / (1.0 + e)   # sigmoid(x)

    d = y - probs
    if float(gamma) == 2.0:
        coeff = -(d * d)                         # |d|^2 == d^2, avoids pow
    else:
        coeff = -(jnp.abs(d) ** gamma)

    loss = (y * alpha * log_probs
            + (1.0 - y) * (1.0 - alpha) * log_1_probs) * coeff

    if needs_mask:
        shape = loss.shape
        row = lax.broadcasted_iota(jnp.int32, shape, 0) + step * block_rows
        col = lax.broadcasted_iota(jnp.int32, shape, 1)
        lin = row * shape[1] + col
        loss = jnp.where(lin < total, loss, 0.0)

    # Cheap per-step VPU add; the cross-lane reduce is deferred to last step.
    acc_ref[...] += loss

    @pl.when(step == pl.num_programs(0) - 1)
    def _finalize():
        out_ref[0, 0] = jnp.sum(acc_ref[...]) * scale


def focal_loss(logits, labels, alpha=0.25, gamma=2.0, reduction="mean"):
    """Binary focal loss matching the PyTorch FocalLoss.forward semantics."""
    assert logits.shape == labels.shape
    if reduction not in ("mean", "sum"):
        # TODO(synk): reduction='none' (elementwise output) not implemented.
        raise NotImplementedError("only 'mean' and 'sum' reductions supported")

    total = int(np.prod(logits.shape))
    rows = pl.cdiv(total, _LANES)
    if rows <= _MAX_BLOCK_ROWS:
        block_rows = rows                 # single block == full first dim
        rows_padded = rows
    else:
        block_rows = _MAX_BLOCK_ROWS      # multiple of 8
        rows_padded = pl.cdiv(rows, block_rows) * block_rows
    padded = rows_padded * _LANES
    needs_mask = padded != total

    x = logits.reshape(-1)
    y = labels.reshape(-1)
    if needs_mask:
        x = jnp.pad(x, (0, padded - total))
        y = jnp.pad(y, (0, padded - total))
    x = x.reshape(rows_padded, _LANES)
    y = y.reshape(rows_padded, _LANES)

    grid = (rows_padded // block_rows,)
    scale = (1.0 / total) if reduction == "mean" else 1.0

    itemsize = logits.dtype.itemsize
    tile_bytes = block_rows * _LANES * itemsize
    acc_bytes = block_rows * _LANES * 4
    # 2 inputs x 2 pipeline buffers + f32 accumulator + slack for internals.
    vmem_limit = 4 * tile_bytes + acc_bytes + (8 << 20)

    kernel = functools.partial(
        _focal_kernel, alpha=float(alpha), gamma=float(gamma), total=total,
        block_rows=block_rows, scale=float(scale), needs_mask=needs_mask)

    out = pl.pallas_call(
        kernel,
        out_shape=jax.ShapeDtypeStruct((1, 1), jnp.float32),
        grid_spec=pltpu.PrefetchScalarGridSpec(
            num_scalar_prefetch=0,
            grid=grid,
            in_specs=[pl.BlockSpec((block_rows, _LANES), lambda i: (i, 0)),
                      pl.BlockSpec((block_rows, _LANES), lambda i: (i, 0))],
            out_specs=pl.BlockSpec(memory_space=pltpu.MemorySpace.SMEM),
            scratch_shapes=[pltpu.VMEM((block_rows, _LANES), jnp.float32)]),
        compiler_params=pltpu.CompilerParams(
            dimension_semantics=("arbitrary",),   # reduction axis (accumulator)
            vmem_limit_bytes=int(vmem_limit)),
        cost_estimate=pl.CostEstimate(
            flops=20 * total,
            transcendentals=3 * total,
            bytes_accessed=2 * total * itemsize + 4),
    )(x, y)
    return out[0, 0]


def _focal_loss_ref(logits, labels, alpha=0.25, gamma=2.0):
    """Pure-JAX reference (mirrors the PyTorch module, reduction='mean')."""
    x = logits.astype(jnp.float32)
    y = labels.astype(jnp.float32)
    probs = jax.nn.sigmoid(x)
    coeff = -(jnp.abs(y - probs) ** gamma)
    log_probs = jax.nn.log_sigmoid(x)
    log_1_probs = jax.nn.log_sigmoid(-x)
    loss = (y * alpha * log_probs + (1.0 - y) * (1.0 - alpha) * log_1_probs) * coeff
    return jnp.mean(loss)


if __name__ == "__main__":
    key = jax.random.PRNGKey(0)
    k1, k2 = jax.random.split(key)
    shape = (2, 4, 16, 16)
    logits = jax.random.normal(k1, shape, dtype=jnp.float32) * 3.0
    labels = jax.random.bernoulli(k2, 0.3, shape).astype(jnp.float32)

    loss = jax.block_until_ready(focal_loss(logits, labels, alpha=0.25, gamma=2))
    ref = jax.block_until_ready(_focal_loss_ref(logits, labels, alpha=0.25, gamma=2.0))

    np.testing.assert_allclose(np.array(loss), np.array(ref), rtol=1e-5, atol=1e-6)
    print("KERNEL_OK")
</pallas_src>

<mosaic_0001>
module attributes {stable_mosaic.version = 11 : i64} {
  func.func @_focal_kernel(%arg0: i32, %arg1: memref<4x512xf32, #tpu.memory_space<vmem>>, %arg2: memref<4x512xf32, #tpu.memory_space<vmem>>, %arg3: memref<1x1xf32, #tpu.memory_space<smem>>, %arg4: memref<4x512xf32, #tpu.memory_space<vmem>>) attributes {dimension_semantics = [#tpu.dimension_semantics<arbitrary>], iteration_bounds = array<i64: 1>, scalar_prefetch = 0 : i64, scratch_operands = 1 : i64, tpu.core_type = #tpu.core_type<tc>, window_params = [{transform_indices = @transform_0, window_bounds = array<i64: 4, 512>}, {transform_indices = @transform_1, window_bounds = array<i64: 4, 512>}, {transform_indices = @transform_2, window_bounds = array<i64: 1, 1>}]} {
    %c0_i32 = arith.constant 0 : i32
    %0 = arith.cmpi eq, %arg0, %c0_i32 : i32
    %1 = arith.extui %0 : i1 to i32
    %c0_i32_0 = arith.constant 0 : i32
    %2 = arith.cmpi ne, %1, %c0_i32_0 : i32
    scf.if %2 {
      %cst_21 = arith.constant 0.000000e+00 : f32
      %49 = vector.broadcast %cst_21 : f32 to vector<4x512xf32>
      %c0_22 = arith.constant 0 : index
      %c0_23 = arith.constant 0 : index
      %50 = vector.load %arg4[%c0_22, %c0_23] : memref<4x512xf32, #tpu.memory_space<vmem>>, vector<4x512xf32>
      tpu.vector_store %arg4[%c0_22, %c0_23], %49 {strides = array<i32>} : memref<4x512xf32, #tpu.memory_space<vmem>>, vector<4x512xf32>,
    } else {
    }
    %c0 = arith.constant 0 : index
    %c0_1 = arith.constant 0 : index
    %3 = vector.load %arg1[%c0, %c0_1] : memref<4x512xf32, #tpu.memory_space<vmem>>, vector<4x512xf32>
    %c0_2 = arith.constant 0 : index
    %c0_3 = arith.constant 0 : index
    %4 = vector.load %arg2[%c0_2, %c0_3] : memref<4x512xf32, #tpu.memory_space<vmem>>, vector<4x512xf32>
    %5 = math.absf %3 : vector<4x512xf32>
    %cst = arith.constant 0.000000e+00 : f32
    %6 = vector.broadcast %cst : f32 to vector<4x512xf32>
    %7 = arith.subf %6, %5 : vector<4x512xf32>
    %8 = math.exp %7 : vector<4x512xf32>
    %cst_4 = arith.constant 1.000000e+00 : f32
    %9 = vector.broadcast %cst_4 : f32 to vector<4x512xf32>
    %10 = arith.addf %9, %8 : vector<4x512xf32>
    %11 = math.log %10 : vector<4x512xf32>
    %cst_5 = arith.constant 0.000000e+00 : f32
    %12 = vector.broadcast %cst_5 : f32 to vector<4x512xf32>
    %13 = arith.cmpf oge, %3, %12 : vector<4x512xf32>
    %cst_6 = arith.constant 0.000000e+00 : f32
    %14 = vector.broadcast %cst_6 : f32 to vector<4x512xf32>
    %15 = arith.subf %14, %11 : vector<4x512xf32>
    %16 = arith.subf %3, %11 : vector<4x512xf32>
    %17 = arith.select %13, %15, %16 : vector<4x512xi1>, vector<4x512xf32>
    %cst_7 = arith.constant 0.000000e+00 : f32
    %18 = vector.broadcast %cst_7 : f32 to vector<4x512xf32>
    %19 = arith.subf %18, %3 : vector<4x512xf32>
    %20 = arith.subf %19, %11 : vector<4x512xf32>
    %cst_8 = arith.constant 0.000000e+00 : f32
    %21 = vector.broadcast %cst_8 : f32 to vector<4x512xf32>
    %22 = arith.subf %21, %11 : vector<4x512xf32>
    %23 = arith.select %13, %20, %22 : vector<4x512xi1>, vector<4x512xf32>
    %cst_9 = arith.constant 1.000000e+00 : f32
    %24 = vector.broadcast %cst_9 : f32 to vector<4x512xf32>
    %25 = arith.select %13, %24, %8 : vector<4x512xi1>, vector<4x512xf32>
    %cst_10 = arith.constant 1.000000e+00 : f32
    %26 = vector.broadcast %cst_10 : f32 to vector<4x512xf32>
    %27 = arith.addf %26, %8 : vector<4x512xf32>
    %28 = arith.divf %25, %27 : vector<4x512xf32>
    %29 = arith.subf %4, %28 : vector<4x512xf32>
    %30 = arith.mulf %29, %29 : vector<4x512xf32>
    %cst_11 = arith.constant 0.000000e+00 : f32
    %31 = vector.broadcast %cst_11 : f32 to vector<4x512xf32>
    %32 = arith.subf %31, %30 : vector<4x512xf32>
    %cst_12 = arith.constant 2.500000e-01 : f32
    %33 = vector.broadcast %cst_12 : f32 to vector<4x512xf32>
    %34 = arith.mulf %4, %33 : vector<4x512xf32>
    %35 = arith.mulf %34, %17 : vector<4x512xf32>
    %cst_13 = arith.constant 1.000000e+00 : f32
    %36 = vector.broadcast %cst_13 : f32 to vector<4x512xf32>
    %37 = arith.subf %36, %4 : vector<4x512xf32>
    %cst_14 = arith.constant 7.500000e-01 : f32
    %38 = vector.broadcast %cst_14 : f32 to vector<4x512xf32>
    %39 = arith.mulf %37, %38 : vector<4x512xf32>
    %40 = arith.mulf %39, %23 : vector<4x512xf32>
    %41 = arith.addf %35, %40 : vector<4x512xf32>
    %42 = arith.mulf %41, %32 : vector<4x512xf32>
    %c0_15 = arith.constant 0 : index
    %c0_16 = arith.constant 0 : index
    %43 = vector.load %arg4[%c0_15, %c0_16] : memref<4x512xf32, #tpu.memory_space<vmem>>, vector<4x512xf32>
    %44 = arith.addf %43, %42 : vector<4x512xf32>
    %c0_17 = arith.constant 0 : index
    %c0_18 = arith.constant 0 : index
    %45 = vector.load %arg4[%c0_17, %c0_18] : memref<4x512xf32, #tpu.memory_space<vmem>>, vector<4x512xf32>
    tpu.vector_store %arg4[%c0_17, %c0_18], %44 {strides = array<i32>} : memref<4x512xf32, #tpu.memory_space<vmem>>, vector<4x512xf32>,
    %c0_i32_19 = arith.constant 0 : i32
    %46 = arith.cmpi eq, %arg0, %c0_i32_19 : i32
    %47 = arith.extui %46 : i1 to i32
    %c0_i32_20 = arith.constant 0 : i32
    %48 = arith.cmpi ne, %47, %c0_i32_20 : i32
    scf.if %48 {
      %c0_21 = arith.constant 0 : index
      %c0_22 = arith.constant 0 : index
      %49 = vector.load %arg4[%c0_21, %c0_22] : memref<4x512xf32, #tpu.memory_space<vmem>>, vector<4x512xf32>
      %50 = vector.shape_cast %49 : vector<4x512xf32> to vector<1x4x512xf32>
      %cst_23 = arith.constant dense<0.000000e+00> : vector<1xf32>
      %51 = vector.multi_reduction <add>, %50, %cst_23 [1, 2] : vector<1x4x512xf32> to vector<1xf32>
      %52 = vector.shape_cast %51 : vector<1xf32> to vector<1x1x1xf32>
      %53 = vector.extract %52[0, 0, 0] : f32 from vector<1x1x1xf32>
      %cst_24 = arith.constant 4.8828125E-4 : f32
      %54 = arith.mulf %53, %cst_24 : f32
      %c0_25 = arith.constant 0 : index
      %c0_26 = arith.constant 0 : index
      %55 = memref.load %arg3[%c0_25, %c0_26] : memref<1x1xf32, #tpu.memory_space<smem>>
      memref.store %54, %arg3[%c0_25, %c0_26] : memref<1x1xf32, #tpu.memory_space<smem>>
    } else {
    }
    return
  }
  func.func @transform_0(%arg0: i32) -> (i32, i32) {
    %c0_i32 = arith.constant 0 : i32
    %c0_i32_0 = arith.constant 0 : i32
    return %arg0, %c0_i32 : i32, i32
  }
  func.func @transform_1(%arg0: i32) -> (i32, i32) {
    %c0_i32 = arith.constant 0 : i32
    %c0_i32_0 = arith.constant 0 : i32
    return %arg0, %c0_i32 : i32, i32
  }
  func.func @transform_2(%arg0: i32) -> (i32, i32) {
    %c0_i32 = arith.constant 0 : i32
    %c0_i32_0 = arith.constant 0 : i32
    %c0_i32_1 = arith.constant 0 : i32
    return %c0_i32, %c0_i32_0 : i32, i32
  }
}

</mosaic_0001>

<bundles_post_ra>
// kernel: tpu_custom_call.1
= control target key start
LH: loop header
LB: loop body
LE: loop exit
PB: predicated region body
PF: predicated region fallthrough
CT: control target
= control target key end

     0   :  { %7 = vsyncpa [#allocation4], 0  ;;  %s289_s0 = inlined_call_operand.hbm [shape: f32[4,512], index: 0, kind: input, shape index: {}]   ;;  %s290_s1 = inlined_call_operand.hbm [shape: f32[4,512], index: 1, kind: input, shape index: {}]   ;;  %s291_s2 = inlined_call_operand.hbm [shape: f32[1,1], index: 2, kind: output, shape index: {}]  }
   0x1   :  { %8 = vsyncpa [#allocation7], 0 }
   0x2   :  { %9 = vsyncpa [#allocation5], 0  ;;  %s229_s9 = smov [#allocation3]   ;;  %s230_s11 = smov [#allocation6]  }
   0x3   :  { %s16_s10 = sshll.u32 %s229_s9, 4  ;;  %s26_s12 = sshll.u32 %s230_s11, 4  ;;  %s17_s10 = int_to_ptr.vmem [resolvable:$true] %s16_s10  ;;  %s27_s12 = int_to_ptr.vmem [resolvable:$true] %s26_s12 }
   0x4   :  { %s169_s15 = scalar_lea.hbm %s289_s0, 256 }
   0x5   :  { %p170_p0 = scmp.ne.s32.totalorder %s289_s0, %s169_s15  ;;  %p173_p1 = scmp.lt.u32.totalorder %s169_s15, %s289_s0 }
   0x7   :  { %p175_p2 = pnand %p173_p1, %p170_p0 }
   0x9   :  { %178 = shalt.err (!%p175_p2)
}
   0xa   :  { %s179_s20 = scalar_lea.vmem %s17_s10, 256  ;;  %p184_p4 = scmp.lt.s32.totalorder %s17_s10, %s17_s10 }
   0xb   :  { %p180_p3 = scmp.ne.s32.totalorder %s17_s10, %s179_s20  ;;  %p185_p5 = scmp.lt.s32.totalorder %s179_s20, %s179_s20 }
   0xd   :  { %p186_p6 = por %p185_p5, %p184_p4 }
   0xf   :  { %p187_p7 = pnand %p186_p6, %p180_p3 }
  0x11   :  { %190 = shalt.err (!%p187_p7)
}
  0x12   :  { %19 = dma.hbm_to_vmem [thread:$0]  %s289_s0, 256, %s17_s10, [#allocation4]  }
  0x13   :  { %s191_s25 = scalar_lea.hbm %s290_s1, 256 }
  0x14   :  { %p192_p8 = scmp.ne.s32.totalorder %s290_s1, %s191_s25  ;;  %p195_p9 = scmp.lt.u32.totalorder %s191_s25, %s290_s1 }
  0x16   :  { %p197_p10 = pnand %p195_p9, %p192_p8 }
  0x18   :  { %200 = shalt.err (!%p197_p10)
}
  0x19   :  { %s201_s30 = scalar_lea.vmem %s27_s12, 256  ;;  %p206_p12 = scmp.lt.s32.totalorder %s27_s12, %s27_s12 }
  0x1a   :  { %p202_p11 = scmp.ne.s32.totalorder %s27_s12, %s201_s30  ;;  %p207_p13 = scmp.lt.s32.totalorder %s201_s30, %s201_s30 }
  0x1c   :  { %p208_p0 = por %p207_p13, %p206_p12 }
  0x1e   :  { %p209_p1 = pnand %p208_p0, %p202_p11 }
  0x20   :  { %212 = shalt.err (!%p209_p1)
}
  0x21   :  { %29 = dma.hbm_to_vmem [thread:$0]  %s290_s1, 256, %s27_s12, [#allocation7]  }
  0x22   :  { %223 = dma.done.wait [#allocation4], 256  }
  0x23   :  { %224 = vsyncadd [#allocation4], 4294967040 }
  0x24   :  { %225 = dma.done.wait [#allocation7], 256  }
  0x25   :  { %226 = vsyncadd [#allocation7], 4294967040  ;;  %v42_v0 = vld [vmem:[#allocation3] sm:$0xff]  ;;  %v43_v1 = vld [vmem:[#allocation3 + $0x8] sm:$0xff]  ;;  %vm117_vm2 = vcmask 1043456   ;;  %s213_s7 = scalar_lea.hbm %s291_s2, 16 }
  0x26   :  { %v46_v2 = vand.u32 2147483647, %v42_v0  ;;  %v47_v3 = vand.u32 2147483647, %v43_v1  ;;  %v44_v12 = vld [vmem:[#allocation6] sm:$0xff]  ;;  %v45_v13 = vld [vmem:[#allocation6 + $0x8] sm:$0xff]  ;;  %p214_p2 = scmp.ne.s32.totalorder %s291_s2, %s213_s7  ;;  %p217_p3 = scmp.lt.u32.totalorder %s213_s7, %s291_s2 }
  0x27   :  { %vm60_vm0 = vcmp.ge.f32.partialorder %v42_v0, 0.0  ;;  %vm61_vm1 = vcmp.ge.f32.partialorder %v43_v1, 0.0  ;;  %v90_v14 = vsub.f32 1.0, %v44_v12  ;;  %v91_v15 = vsub.f32 1.0, %v45_v13 }
  0x28   :  { %v48_v4 = vsub.f32 0.0, %v46_v2  ;;  %v49_v5 = vsub.f32 0.0, %v47_v3  ;;  %v68_v16 = vsub.f32 0.0, %v42_v0  ;;  %v69_v18 = vsub.f32 0.0, %v43_v1  ;;  %p219_p4 = pnand %p217_p3, %p214_p2 }
  0x29   :  { %v86_v23 = vmul.f32 0.25, %v44_v12  ;;  %v87_v26 = vmul.f32 0.25, %v45_v13  ;;  %v92_v27 = vmul.f32 0.75, %v90_v14  ;;  %v93_v28 = vmul.f32 0.75, %v91_v15 }
  0x2a   :  { %v50_v6 = vmul.f32 1.442695, %v48_v4  ;;  %v52_v7 = vmul.f32 1.442695, %v49_v5 }
  0x2c   :  { %157 = vpow2.f32 %v50_v6 }
  0x2d   :  { %159 = vpow2.f32 %v52_v7 }
  0x36   :  { %v158_v8 = vpop.eup %157 }
  0x37   :  { %v160_v9 = vpop.eup %159  ;;  %v54_v10 = vadd.f32 1.0, %v158_v8  ;;  %v74_v19 = vsel %vm60_vm0, 1.0, %v158_v8 }
  0x38   :  { %v55_v11 = vadd.f32 1.0, %v160_v9  ;;  %v75_v22 = vsel %vm61_vm1, 1.0, %v160_v9 }
  0x39   :  { %161 = vlog2.f32 %v54_v10 }
  0x3a   :  { %163 = vlog2.f32 %v55_v11 }
  0x3b   :  { %165 = vrcp.f32 %v54_v10 }
  0x3c   :  { %167 = vrcp.f32 %v55_v11 }
  0x43   :  { %v162_v17 = vpop.eup %161 }
  0x44   :  { %v164_v20 = vpop.eup %163  ;;  %v57_v21 = vmul.f32 0.6931472, %v162_v17 }
  0x45   :  { %v166_v24 = vpop.eup %165  ;;  %v59_v25 = vmul.f32 0.6931472, %v164_v20 }
  0x46   :  { %v168_v29 = vpop.eup %167  ;;  %v62_v30 = vsub.f32 0.0, %v57_v21  ;;  %v64_v31 = vsub.f32 %v42_v0, %v57_v21  ;;  %v70_v32 = vsub.f32 %v68_v16, %v57_v21  ;;  %v77_v33 = vmul.f32 %v166_v24, %v74_v19 }
  0x47   :  { %v63_v34 = vsub.f32 0.0, %v59_v25  ;;  %v65_v35 = vsub.f32 %v43_v1, %v59_v25  ;;  %v71_v36 = vsub.f32 %v69_v18, %v59_v25  ;;  %v79_v37 = vmul.f32 %v168_v29, %v75_v22 }
  0x48   :  { %v66_v38 = vsel %vm60_vm0, %v62_v30, %v64_v31  ;;  %v72_v39 = vsel %vm60_vm0, %v70_v32, %v62_v30  ;;  %v80_v40 = vsub.f32 %v44_v12, %v77_v33 }
  0x49   :  { %v67_v41 = vsel %vm61_vm1, %v63_v34, %v65_v35  ;;  %v73_v42 = vsel %vm61_vm1, %v71_v36, %v63_v34  ;;  %v81_v43 = vsub.f32 %v45_v13, %v79_v37  ;;  %v88_v44 = vmul.f32 %v86_v23, %v66_v38 }
  0x4a   :  { %v82_v45 = vmul.f32 %v80_v40, %v80_v40  ;;  %v89_v46 = vmul.f32 %v87_v26, %v67_v41  ;;  %v94_v47 = vmul.f32 %v92_v27, %v72_v39  ;;  %v95_v48 = vmul.f32 %v93_v28, %v73_v42 }
  0x4b   :  { %v83_v49 = vmul.f32 %v81_v43, %v81_v43 }
  0x4c   :  { %v84_v50 = vsub.f32 0.0, %v82_v45  ;;  %v96_v51 = vadd.f32 %v94_v47, %v88_v44  ;;  %v97_v52 = vadd.f32 %v95_v48, %v89_v46 }
  0x4d   :  { %v85_v53 = vsub.f32 0.0, %v83_v49 }
  0x4e   :  { %v98_v54 = vmul.f32 %v96_v51, %v84_v50 }
  0x4f   :  { %v99_v55 = vmul.f32 %v97_v52, %v85_v53 }
  0x50   :  { %v113_v56 = vcombine.high %v98_v54, %v98_v54  ;;  %v118_v57 = vsel %vm117_vm2, %v98_v54, 0.0 }
  0x51   :  { %v114_v58 = vcombine.high %v99_v55, %v99_v55  ;;  %v121_v60 = vsel %vm117_vm2, %v99_v55, 0.0 }
  0x52   :  { %v119_v59 = vsel %vm117_vm2, %v113_v56, 0.0 }
  0x53   :  { %v120_v61 = vadd.f32 %v119_v59, %v118_v57  ;;  %v123_v62 = vsel %vm117_vm2, %v114_v58, 0.0 }
  0x55   :  { %v122_v63 = vadd.f32 %v121_v60, %v120_v61 }
  0x57   :  { %v124_v0 = vadd.f32 %v123_v62, %v122_v63 }
  0x59   :  { %125 = vadd.xlane.f32.xlu0 %v124_v0 }
  0xe6   :  { %v126_v1 = vpop.xlane.xlu0 %125 }
  0xe7   :  { %v127_v2 = vrot.slane %v126_v1, 4 }
  0xe9   :  { %v128_v3 = vadd.f32 %v127_v2, %v126_v1 }
  0xeb   :  { %v129_v4 = vrot.slane %v128_v3, 2 }
  0xed   :  { %v130_v5 = vadd.f32 %v129_v4, %v128_v3 }
  0xef   :  { %v131_v6 = vrot.slane %v130_v5, 1 }
  0xf1   :  { %v132_v7 = vadd.f32 %v131_v6, %v130_v5 }
  0xf3   :  { %152 = vpush %v132_v7 }
 0x124   :  { %s153_s1 = spop %152 }
 0x125   :  { %s134_s4 = smul.f32 0.00048828125, %s153_s1 }
 0x127   :  { %136 = sst [smem:[#allocation8]] %s134_s4 }
 0x128   :  { %222 = shalt.err (!%p219_p4)
}
 0x129   :  { %s231_s12 = smov [#allocation8]  }
 0x12a   :  { %144 = dma.smem_to_hbm %s231_s12, 16, %s291_s2, [#allocation5]  }
 0x12b   :  { %227 = dma.done.wait [#allocation5], 16  }
 0x12c   :  { %228 = vsyncadd [#allocation5], 4294967280 }
 0x12d   :  { %148 = sfence }
 0x12e   :  { %149 = vsyncpa [#allocation4], 1 }
 0x12f   :  { %150 = vsyncpa [#allocation7], 1 }
 0x130   :  { %151 = vsyncpa [#allocation5], 1 }

</bundles_post_ra>
